<compile_context>
chip_gen: v5e
topology: v5e:2x2
jax: 0.10.0
libtpu: 0.0.40
codegen_flags: <defaults>
</compile_context>

<pallas_src>
import functools
import math

import jax
import jax.numpy as jnp
from jax.experimental import pallas as pl
from jax.experimental.pallas import tpu as pltpu

# ----------------------------- config ---------------------------------------
B, T, NX, NH = 2, 8, 32, 4          # batch, seq (= n_ctx = max_positions), n_embd, n_head
HD = NX // NH                       # head dim
EPS = 1e-5                          # layer_norm_epsilon
PARALLEL = True                     # config.parallel
SCALE = False                       # Attention(scale=False), Block default
NEG = 1e10


# ----------------------------- kernel ---------------------------------------
def _rmsnorm(v, g, eps):
    return v * jax.lax.rsqrt(jnp.mean(v * v, axis=-1, keepdims=True) + eps) * g


def block_kernel(x_ref, g1_ref, wqk_ref, bqk_ref, g2_ref,
                 wfc_ref, bfc_ref, wpr_ref, bpr_ref,
                 skip_ref, centre_ref, pv_ref,
                 out_ref, k_ref, yn_ref, *, eps, scale, parallel):
    """One grid step = one batch element; whole Block fused, VMEM resident."""
    x = x_ref[0].astype(jnp.float32)                       # [T, NX]
    t, nx = x.shape
    nh = skip_ref.shape[0]
    hd = nx // nh

    # ---- ln_1 + c_attn (fused) ----
    xn1 = _rmsnorm(x, g1_ref[...], eps)                    # [T, NX]
    qk = jnp.dot(xn1, wqk_ref[...],
                 preferred_element_type=jnp.float32) + bqk_ref[...]   # [T, 2NX]
    q = qk[:, :nx]
    k = qk[:, nx:]
    yn_ref[0] = xn1        # value (= attention input) -> `present`
    k_ref[0] = k           # key                      -> `present`

    # ---- causal / diag / uniform matrices from iota (no host buffers) ----
    row = jax.lax.broadcasted_iota(jnp.int32, (t, t), 0)
    col = jax.lax.broadcasted_iota(jnp.int32, (t, t), 1)
    causal = col <= row
    inv_pos = 1.0 / (row.astype(jnp.float32) + 1.0)
    uniform = jnp.where(causal, inv_pos, 0.0)              # tril(1/(i+1))
    diag = jnp.where(col == row, 1.0, 0.0)                 # eye(T)

    # ---- attention; heads are static lane slices (NH small, unrolled) ----
    head_outs = []
    for h in range(nh):
        lo = h * hd
        qh = q[:, lo:lo + hd]                              # [T, hd]
        kh = k[:, lo:lo + hd]                              # [T, hd]
        vh = xn1[:, lo:lo + hd]                            # [T, hd]  (value = ln_1(x))
        w = jax.lax.dot_general(qh, kh, (((1,), (1,)), ((), ())),
                                preferred_element_type=jnp.float32)   # q @ k^T  [T, T]
        if scale:
            w = w * (1.0 / math.sqrt(hd))
        w = jnp.where(causal, w, -NEG)                     # == w*b - NEG*(1-b)
        w = w - jnp.max(w, axis=-1, keepdims=True)
        e = jnp.exp(w)
        p = e * pl.reciprocal(jnp.sum(e, axis=-1, keepdims=True), approx=True)
        # post-softmax bias matrix (per-head SMEM scalar gains)
        p = p + skip_ref[h] * diag - centre_ref[h] * uniform
        head_outs.append(jnp.dot(p, vh, preferred_element_type=jnp.float32))
    a = jnp.concatenate(head_outs, axis=-1) * pv_ref[0]    # merge_heads * proj_value

    # ---- ln_2 + MLP + residual (fused) ----
    z = x if parallel else a
    xn2 = _rmsnorm(z, g2_ref[...], eps)
    hdn = jnp.dot(xn2, wfc_ref[...],
                  preferred_element_type=jnp.float32) + bfc_ref[...]
    hdn = jnp.maximum(hdn, 0.0)                            # LeakyReLU(0) == ReLU
    m = jnp.dot(hdn, wpr_ref[...],
                preferred_element_type=jnp.float32) + bpr_ref[...]
    out_ref[0] = a + m


# ----------------------------- wrapper ---------------------------------------
def block_forward(x, params):
    b, t, nx = x.shape
    nh = params["attn_mat_skip_gain"].shape[0]
    hd = nx // nh
    kernel = functools.partial(block_kernel, eps=EPS, scale=SCALE, parallel=PARALLEL)

    def full(shape):
        return pl.BlockSpec(shape, lambda i: (0,) * len(shape))

    smem = pl.BlockSpec(memory_space=pltpu.MemorySpace.SMEM)

    out, k_out, yn_out = pl.pallas_call(
        kernel,
        grid=(b,),
        in_specs=[
            pl.BlockSpec((1, t, nx), lambda i: (i, 0, 0)),     # x (one batch per step)
            full((1, nx)),                                     # ln1_g
            full((nx, 2 * nx)),                                # c_attn_w
            full((1, 2 * nx)),                                 # c_attn_b
            full((1, nx)),                                     # ln2_g
            full((nx, 4 * nx)),                                # c_fc_w
            full((1, 4 * nx)),                                 # c_fc_b
            full((4 * nx, nx)),                                # c_proj_w
            full((1, nx)),                                     # c_proj_b
            smem,                                              # attn_mat_skip_gain [NH]
            smem,                                              # centre_attn_gain   [NH]
            smem,                                              # proj_value         [1]
        ],
        out_specs=[
            pl.BlockSpec((1, t, nx), lambda i: (i, 0, 0)),     # out = a + m
            pl.BlockSpec((1, t, nx), lambda i: (i, 0, 0)),     # key   (lane-dense)
            pl.BlockSpec((1, t, nx), lambda i: (i, 0, 0)),     # value (= ln_1(x))
        ],
        out_shape=[jax.ShapeDtypeStruct((b, t, nx), jnp.float32)] * 3,
        compiler_params=pltpu.CompilerParams(
            dimension_semantics=("parallel",)),                # batch -> 2 TCs on v7x
    )(x, params["ln1_g"], params["c_attn_w"], params["c_attn_b"],
      params["ln2_g"], params["c_fc_w"], params["c_fc_b"],
      params["c_proj_w"], params["c_proj_b"],
      params["attn_mat_skip_gain"], params["centre_attn_gain"],
      params["proj_value"])

    # present = stack(split_heads(key), split_heads(value)); pure layout glue
    # to match the module's [2, B, H, T, hd] output spec.
    def split_heads(v):  # [B,T,C] -> [B,H,T,hd]
        return v.reshape(b, t, nh, hd).transpose(0, 2, 1, 3)

    present = jnp.stack([split_heads(k_out), split_heads(yn_out)])
    return out, present


# ----------------------------- pure-JAX reference ----------------------------
def block_reference(x, params):
    hp = jax.lax.Precision.HIGHEST
    b, t, nx = x.shape
    nh = params["attn_mat_skip_gain"].shape[0]

    def rms(v, g):
        return v * jax.lax.rsqrt(jnp.mean(v * v, -1, keepdims=True) + EPS) * g.reshape(-1)

    y = rms(x, params["ln1_g"])
    qk = jnp.einsum("btc,cf->btf", y, params["c_attn_w"], precision=hp) + params["c_attn_b"].reshape(-1)
    q, k = jnp.split(qk, 2, -1)
    sh = lambda v: v.reshape(b, t, nh, -1).transpose(0, 2, 1, 3)
    qh, kh, vh = sh(q), sh(k), sh(y)
    present = jnp.stack([kh, vh])
    w = jnp.einsum("bhtd,bhsd->bhts", qh, kh, precision=hp)
    if SCALE:
        w = w / math.sqrt(nx // nh)
    mask = jnp.tril(jnp.ones((t, t), jnp.float32))
    w = w * mask - NEG * (1 - mask)
    w = jax.nn.softmax(w, -1)
    diag = jnp.eye(t, dtype=jnp.float32)
    uniform = jnp.tril(jnp.ones((t, t), jnp.float32) / jnp.arange(1, t + 1, dtype=jnp.float32)[:, None])
    pbias = (params["attn_mat_skip_gain"].reshape(1, nh, 1, 1) * diag
             - params["centre_attn_gain"].reshape(1, nh, 1, 1) * uniform)
    ah = jnp.einsum("bhts,bhsd->bhtd", w + pbias, vh, precision=hp)
    a = ah.transpose(0, 2, 1, 3).reshape(b, t, nx) * params["proj_value"]
    z = rms(x if PARALLEL else a, params["ln2_g"])
    h = jnp.maximum(
        jnp.einsum("btc,cf->btf", z, params["c_fc_w"], precision=hp) + params["c_fc_b"].reshape(-1), 0.0)
    m = jnp.einsum("btf,fc->btc", h, params["c_proj_w"], precision=hp) + params["c_proj_b"].reshape(-1)
    return a + m, present


# ----------------------------- main ------------------------------------------
def init_params(key):
    k1, k2, k3, k4, k5, k6 = jax.random.split(key, 6)
    return dict(
        ln1_g=jnp.ones((1, NX), jnp.float32),
        ln2_g=jnp.ones((1, NX), jnp.float32),
        c_attn_w=0.02 * jax.random.normal(k1, (NX, 2 * NX), jnp.float32),
        c_attn_b=jnp.zeros((1, 2 * NX), jnp.float32),
        c_fc_w=0.02 * jax.random.normal(k2, (NX, 4 * NX), jnp.float32),
        c_fc_b=jnp.zeros((1, 4 * NX), jnp.float32),
        c_proj_w=0.02 * jax.random.normal(k3, (4 * NX, NX), jnp.float32),
        c_proj_b=jnp.zeros((1, NX), jnp.float32),
        # perturb gains so the per-head SMEM path is actually exercised
        attn_mat_skip_gain=1.0 + 0.1 * jax.random.normal(k4, (NH,), jnp.float32),
        centre_attn_gain=1.0 + 0.1 * jax.random.normal(k5, (NH,), jnp.float32),
        attn_mat_resid_gain=jnp.ones((NH,), jnp.float32),  # defined but unused in forward (as in PyTorch)
        proj_value=1.0 + 0.1 * jax.random.normal(k6, (1,), jnp.float32),
    )


if __name__ == "__main__":
    key = jax.random.PRNGKey(0)
    kx, kp = jax.random.split(key)
    x = jax.random.normal(kx, (B, T, NX), jnp.float32)
    params = init_params(kp)

    out, present = jax.block_until_ready(block_forward(x, params))
    out_ref, present_ref = block_reference(x, params)

    assert out.shape == (B, T, NX), out.shape
    assert present.shape == (2, B, NH, T, HD), present.shape
    assert bool(jnp.all(jnp.isfinite(out)))
    # 2e-3: the only deviation from the f32 reference is the EUP approx
    # reciprocal in the softmax denominator.
    assert jnp.allclose(out, out_ref, atol=2e-3, rtol=2e-3), float(jnp.max(jnp.abs(out - out_ref)))
    assert jnp.allclose(present, present_ref, atol=1e-3, rtol=1e-3)

    print("KERNEL_OK")
</pallas_src>

<mosaic_0001>
module attributes {stable_mosaic.version = 11 : i64} {
  func.func @block_kernel(%arg0: i32, %arg1: memref<1x8x32xf32, #tpu.memory_space<vmem>>, %arg2: memref<1x32xf32, #tpu.memory_space<vmem>>, %arg3: memref<32x64xf32, #tpu.memory_space<vmem>>, %arg4: memref<1x64xf32, #tpu.memory_space<vmem>>, %arg5: memref<1x32xf32, #tpu.memory_space<vmem>>, %arg6: memref<32x128xf32, #tpu.memory_space<vmem>>, %arg7: memref<1x128xf32, #tpu.memory_space<vmem>>, %arg8: memref<128x32xf32, #tpu.memory_space<vmem>>, %arg9: memref<1x32xf32, #tpu.memory_space<vmem>>, %arg10: memref<4xf32, #tpu.memory_space<smem>>, %arg11: memref<4xf32, #tpu.memory_space<smem>>, %arg12: memref<1xf32, #tpu.memory_space<smem>>, %arg13: memref<1x8x32xf32, #tpu.memory_space<vmem>>, %arg14: memref<1x8x32xf32, #tpu.memory_space<vmem>>, %arg15: memref<1x8x32xf32, #tpu.memory_space<vmem>>) attributes {dimension_semantics = [#tpu.dimension_semantics<parallel>], iteration_bounds = array<i64: 2>, scalar_prefetch = 0 : i64, scratch_operands = 0 : i64, tpu.core_type = #tpu.core_type<tc>, window_params = [{transform_indices = @transform_0, window_bounds = array<i64: 1, 8, 32>}, {pipeline_mode = #tpu.pipeline_mode<synchronous>, transform_indices = @transform_1, window_bounds = array<i64: 1, 32>}, {pipeline_mode = #tpu.pipeline_mode<synchronous>, transform_indices = @transform_2, window_bounds = array<i64: 32, 64>}, {pipeline_mode = #tpu.pipeline_mode<synchronous>, transform_indices = @transform_3, window_bounds = array<i64: 1, 64>}, {pipeline_mode = #tpu.pipeline_mode<synchronous>, transform_indices = @transform_4, window_bounds = array<i64: 1, 32>}, {pipeline_mode = #tpu.pipeline_mode<synchronous>, transform_indices = @transform_5, window_bounds = array<i64: 32, 128>}, {pipeline_mode = #tpu.pipeline_mode<synchronous>, transform_indices = @transform_6, window_bounds = array<i64: 1, 128>}, {pipeline_mode = #tpu.pipeline_mode<synchronous>, transform_indices = @transform_7, window_bounds = array<i64: 128, 32>}, {pipeline_mode = #tpu.pipeline_mode<synchronous>, transform_indices = @transform_8, window_bounds = array<i64: 1, 32>}, {transform_indices = @transform_9, window_bounds = array<i64: 4>}, {transform_indices = @transform_10, window_bounds = array<i64: 4>}, {transform_indices = @transform_11, window_bounds = array<i64: 1>}, {transform_indices = @transform_12, window_bounds = array<i64: 1, 8, 32>}, {transform_indices = @transform_13, window_bounds = array<i64: 1, 8, 32>}, {transform_indices = @transform_14, window_bounds = array<i64: 1, 8, 32>}]} {
    %c0 = arith.constant 0 : index
    %c0_0 = arith.constant 0 : index
    %c0_1 = arith.constant 0 : index
    %0 = vector.load %arg1[%c0, %c0_0, %c0_1] : memref<1x8x32xf32, #tpu.memory_space<vmem>>, vector<1x8x32xf32>
    %1 = vector.shape_cast %0 : vector<1x8x32xf32> to vector<8x32xf32>
    %c0_2 = arith.constant 0 : index
    %c0_3 = arith.constant 0 : index
    %2 = vector.load %arg2[%c0_2, %c0_3] : memref<1x32xf32, #tpu.memory_space<vmem>>, vector<1x32xf32>
    %3 = arith.mulf %1, %1 : vector<8x32xf32>
    %cst = arith.constant dense<0.000000e+00> : vector<8xf32>
    %4 = vector.multi_reduction <add>, %3, %cst [1] : vector<8x32xf32> to vector<8xf32>
    %5 = vector.shape_cast %4 : vector<8xf32> to vector<8x1xf32>
    %cst_4 = arith.constant 3.200000e+01 : f32
    %6 = vector.broadcast %cst_4 : f32 to vector<8x1xf32>
    %7 = arith.divf %5, %6 : vector<8x1xf32>
    %cst_5 = arith.constant 9.99999974E-6 : f32
    %8 = vector.broadcast %cst_5 : f32 to vector<8x1xf32>
    %9 = arith.addf %7, %8 : vector<8x1xf32>
    %10 = math.rsqrt %9 : vector<8x1xf32>
    %11 = vector.broadcast %10 : vector<8x1xf32> to vector<8x32xf32>
    %12 = arith.mulf %1, %11 : vector<8x32xf32>
    %13 = vector.broadcast %2 : vector<1x32xf32> to vector<8x32xf32>
    %14 = arith.mulf %12, %13 : vector<8x32xf32>
    %c0_6 = arith.constant 0 : index
    %c0_7 = arith.constant 0 : index
    %15 = vector.load %arg3[%c0_6, %c0_7] : memref<32x64xf32, #tpu.memory_space<vmem>>, vector<32x64xf32>
    %cst_8 = arith.constant dense<0.000000e+00> : vector<8x64xf32>
    %16 = tpu.matmul %14, %15, %cst_8 {dimension_numbers = #tpu.dot_dimension_numbers<[1], [0], [0], [1], [0, 0, 1, 1], [], []>} : vector<8x32xf32>, vector<32x64xf32>, vector<8x64xf32> -> vector<8x64xf32>
    %c0_9 = arith.constant 0 : index
    %c0_10 = arith.constant 0 : index
    %17 = vector.load %arg4[%c0_9, %c0_10] : memref<1x64xf32, #tpu.memory_space<vmem>>, vector<1x64xf32>
    %18 = vector.broadcast %17 : vector<1x64xf32> to vector<8x64xf32>
    %19 = arith.addf %16, %18 : vector<8x64xf32>
    %20 = vector.extract_strided_slice %19 {offsets = [0, 0], sizes = [8, 32], strides = [1, 1]} : vector<8x64xf32> to vector<8x32xf32>
    %21 = vector.extract_strided_slice %19 {offsets = [0, 32], sizes = [8, 32], strides = [1, 1]} : vector<8x64xf32> to vector<8x32xf32>
    %c0_11 = arith.constant 0 : index
    %c0_12 = arith.constant 0 : index
    %c0_13 = arith.constant 0 : index
    %22 = vector.load %arg15[%c0_11, %c0_12, %c0_13] : memref<1x8x32xf32, #tpu.memory_space<vmem>>, vector<1x8x32xf32>
    %23 = vector.shape_cast %22 : vector<1x8x32xf32> to vector<8x32xf32>
    %24 = vector.shape_cast %14 : vector<8x32xf32> to vector<1x8x32xf32>
    tpu.vector_store %arg15[%c0_11, %c0_12, %c0_13], %24 {strides = array<i32>} : memref<1x8x32xf32, #tpu.memory_space<vmem>>, vector<1x8x32xf32>,
    %c0_14 = arith.constant 0 : index
    %c0_15 = arith.constant 0 : index
    %c0_16 = arith.constant 0 : index
    %25 = vector.load %arg14[%c0_14, %c0_15, %c0_16] : memref<1x8x32xf32, #tpu.memory_space<vmem>>, vector<1x8x32xf32>
    %26 = vector.shape_cast %25 : vector<1x8x32xf32> to vector<8x32xf32>
    %27 = vector.shape_cast %21 : vector<8x32xf32> to vector<1x8x32xf32>
    tpu.vector_store %arg14[%c0_14, %c0_15, %c0_16], %27 {strides = array<i32>} : memref<1x8x32xf32, #tpu.memory_space<vmem>>, vector<1x8x32xf32>,
    %28 = tpu.iota {dimensions = array<i32: 0>} : vector<8x8xi32>
    %29 = tpu.iota {dimensions = array<i32: 1>} : vector<8x8xi32>
    %30 = arith.cmpi sle, %29, %28 : vector<8x8xi32>
    %31 = arith.sitofp %28 : vector<8x8xi32> to vector<8x8xf32>
    %cst_17 = arith.constant 1.000000e+00 : f32
    %32 = vector.broadcast %cst_17 : f32 to vector<8x8xf32>
    %33 = arith.addf %31, %32 : vector<8x8xf32>
    %cst_18 = arith.constant 1.000000e+00 : f32
    %34 = vector.broadcast %cst_18 : f32 to vector<8x8xf32>
    %35 = arith.divf %34, %33 : vector<8x8xf32>
    %cst_19 = arith.constant 0.000000e+00 : f32
    %36 = vector.broadcast %cst_19 : f32 to vector<8x8xf32>
    %37 = arith.select %30, %35, %36 : vector<8x8xi1>, vector<8x8xf32>
    %38 = arith.cmpi eq, %29, %28 : vector<8x8xi32>
    %cst_20 = arith.constant 1.000000e+00 : f32
    %cst_21 = arith.constant 0.000000e+00 : f32
    %39 = vector.broadcast %cst_20 : f32 to vector<8x8xf32>
    %40 = vector.broadcast %cst_21 : f32 to vector<8x8xf32>
    %41 = arith.select %38, %39, %40 : vector<8x8xi1>, vector<8x8xf32>
    %42 = vector.extract_strided_slice %20 {offsets = [0, 0], sizes = [8, 8], strides = [1, 1]} : vector<8x32xf32> to vector<8x8xf32>
    %43 = vector.extract_strided_slice %21 {offsets = [0, 0], sizes = [8, 8], strides = [1, 1]} : vector<8x32xf32> to vector<8x8xf32>
    %44 = vector.extract_strided_slice %14 {offsets = [0, 0], sizes = [8, 8], strides = [1, 1]} : vector<8x32xf32> to vector<8x8xf32>
    %cst_22 = arith.constant dense<0.000000e+00> : vector<8x8xf32>
    %45 = tpu.matmul %42, %43, %cst_22 {dimension_numbers = #tpu.dot_dimension_numbers<[1], [1], [0], [0], [0, 0, 1, 0], [], []>} : vector<8x8xf32>, vector<8x8xf32>, vector<8x8xf32> -> vector<8x8xf32>
    %cst_23 = arith.constant -1.000000e+10 : f32
    %46 = vector.broadcast %cst_23 : f32 to vector<8x8xf32>
    %47 = arith.select %30, %45, %46 : vector<8x8xi1>, vector<8x8xf32>
    %cst_24 = arith.constant dense<0xFF800000> : vector<8xf32>
    %48 = vector.multi_reduction <maximumf>, %47, %cst_24 [1] : vector<8x8xf32> to vector<8xf32>
    %49 = vector.shape_cast %48 : vector<8xf32> to vector<8x1xf32>
    %50 = vector.broadcast %49 : vector<8x1xf32> to vector<8x8xf32>
    %51 = arith.subf %47, %50 : vector<8x8xf32>
    %52 = math.exp %51 : vector<8x8xf32>
    %cst_25 = arith.constant dense<0.000000e+00> : vector<8xf32>
    %53 = vector.multi_reduction <add>, %52, %cst_25 [1] : vector<8x8xf32> to vector<8xf32>
    %54 = vector.shape_cast %53 : vector<8xf32> to vector<8x1xf32>
    %55 = tpu.reciprocal %54 {approx = true} : vector<8x1xf32> -> vector<8x1xf32>
    %56 = vector.broadcast %55 : vector<8x1xf32> to vector<8x8xf32>
    %57 = arith.mulf %52, %56 : vector<8x8xf32>
    %c0_26 = arith.constant 0 : index
    %58 = memref.load %arg10[%c0_26] : memref<4xf32, #tpu.memory_space<smem>>
    %59 = vector.broadcast %58 : f32 to vector<8x8xf32>
    %60 = arith.mulf %59, %41 : vector<8x8xf32>
    %61 = arith.addf %57, %60 : vector<8x8xf32>
    %c0_27 = arith.constant 0 : index
    %62 = memref.load %arg11[%c0_27] : memref<4xf32, #tpu.memory_space<smem>>
    %63 = vector.broadcast %62 : f32 to vector<8x8xf32>
    %64 = arith.mulf %63, %37 : vector<8x8xf32>
    %65 = arith.subf %61, %64 : vector<8x8xf32>
    %cst_28 = arith.constant dense<0.000000e+00> : vector<8x8xf32>
    %66 = tpu.matmul %65, %44, %cst_28 {dimension_numbers = #tpu.dot_dimension_numbers<[1], [0], [0], [1], [0, 0, 1, 1], [], []>} : vector<8x8xf32>, vector<8x8xf32>, vector<8x8xf32> -> vector<8x8xf32>
    %67 = vector.extract_strided_slice %20 {offsets = [0, 8], sizes = [8, 8], strides = [1, 1]} : vector<8x32xf32> to vector<8x8xf32>
    %68 = vector.extract_strided_slice %21 {offsets = [0, 8], sizes = [8, 8], strides = [1, 1]} : vector<8x32xf32> to vector<8x8xf32>
    %69 = vector.extract_strided_slice %14 {offsets = [0, 8], sizes = [8, 8], strides = [1, 1]} : vector<8x32xf32> to vector<8x8xf32>
    %cst_29 = arith.constant dense<0.000000e+00> : vector<8x8xf32>
    %70 = tpu.matmul %67, %68, %cst_29 {dimension_numbers = #tpu.dot_dimension_numbers<[1], [1], [0], [0], [0, 0, 1, 0], [], []>} : vector<8x8xf32>, vector<8x8xf32>, vector<8x8xf32> -> vector<8x8xf32>
    %cst_30 = arith.constant -1.000000e+10 : f32
    %71 = vector.broadcast %cst_30 : f32 to vector<8x8xf32>
    %72 = arith.select %30, %70, %71 : vector<8x8xi1>, vector<8x8xf32>
    %cst_31 = arith.constant dense<0xFF800000> : vector<8xf32>
    %73 = vector.multi_reduction <maximumf>, %72, %cst_31 [1] : vector<8x8xf32> to vector<8xf32>
    %74 = vector.shape_cast %73 : vector<8xf32> to vector<8x1xf32>
    %75 = vector.broadcast %74 : vector<8x1xf32> to vector<8x8xf32>
    %76 = arith.subf %72, %75 : vector<8x8xf32>
    %77 = math.exp %76 : vector<8x8xf32>
    %cst_32 = arith.constant dense<0.000000e+00> : vector<8xf32>
    %78 = vector.multi_reduction <add>, %77, %cst_32 [1] : vector<8x8xf32> to vector<8xf32>
    %79 = vector.shape_cast %78 : vector<8xf32> to vector<8x1xf32>
    %80 = tpu.reciprocal %79 {approx = true} : vector<8x1xf32> -> vector<8x1xf32>
    %81 = vector.broadcast %80 : vector<8x1xf32> to vector<8x8xf32>
    %82 = arith.mulf %77, %81 : vector<8x8xf32>
    %c1 = arith.constant 1 : index
    %83 = memref.load %arg10[%c1] : memref<4xf32, #tpu.memory_space<smem>>
    %84 = vector.broadcast %83 : f32 to vector<8x8xf32>
    %85 = arith.mulf %84, %41 : vector<8x8xf32>
    %86 = arith.addf %82, %85 : vector<8x8xf32>
    %c1_33 = arith.constant 1 : index
    %87 = memref.load %arg11[%c1_33] : memref<4xf32, #tpu.memory_space<smem>>
    %88 = vector.broadcast %87 : f32 to vector<8x8xf32>
    %89 = arith.mulf %88, %37 : vector<8x8xf32>
    %90 = arith.subf %86, %89 : vector<8x8xf32>
    %cst_34 = arith.constant dense<0.000000e+00> : vector<8x8xf32>
    %91 = tpu.matmul %90, %69, %cst_34 {dimension_numbers = #tpu.dot_dimension_numbers<[1], [0], [0], [1], [0, 0, 1, 1], [], []>} : vector<8x8xf32>, vector<8x8xf32>, vector<8x8xf32> -> vector<8x8xf32>
    %92 = vector.extract_strided_slice %20 {offsets = [0, 16], sizes = [8, 8], strides = [1, 1]} : vector<8x32xf32> to vector<8x8xf32>
    %93 = vector.extract_strided_slice %21 {offsets = [0, 16], sizes = [8, 8], strides = [1, 1]} : vector<8x32xf32> to vector<8x8xf32>
    %94 = vector.extract_strided_slice %14 {offsets = [0, 16], sizes = [8, 8], strides = [1, 1]} : vector<8x32xf32> to vector<8x8xf32>
    %cst_35 = arith.constant dense<0.000000e+00> : vector<8x8xf32>
    %95 = tpu.matmul %92, %93, %cst_35 {dimension_numbers = #tpu.dot_dimension_numbers<[1], [1], [0], [0], [0, 0, 1, 0], [], []>} : vector<8x8xf32>, vector<8x8xf32>, vector<8x8xf32> -> vector<8x8xf32>
    %cst_36 = arith.constant -1.000000e+10 : f32
    %96 = vector.broadcast %cst_36 : f32 to vector<8x8xf32>
    %97 = arith.select %30, %95, %96 : vector<8x8xi1>, vector<8x8xf32>
    %cst_37 = arith.constant dense<0xFF800000> : vector<8xf32>
    %98 = vector.multi_reduction <maximumf>, %97, %cst_37 [1] : vector<8x8xf32> to vector<8xf32>
    %99 = vector.shape_cast %98 : vector<8xf32> to vector<8x1xf32>
    %100 = vector.broadcast %99 : vector<8x1xf32> to vector<8x8xf32>
    %101 = arith.subf %97, %100 : vector<8x8xf32>
    %102 = math.exp %101 : vector<8x8xf32>
    %cst_38 = arith.constant dense<0.000000e+00> : vector<8xf32>
    %103 = vector.multi_reduction <add>, %102, %cst_38 [1] : vector<8x8xf32> to vector<8xf32>
    %104 = vector.shape_cast %103 : vector<8xf32> to vector<8x1xf32>
    %105 = tpu.reciprocal %104 {approx = true} : vector<8x1xf32> -> vector<8x1xf32>
    %106 = vector.broadcast %105 : vector<8x1xf32> to vector<8x8xf32>
    %107 = arith.mulf %102, %106 : vector<8x8xf32>
    %c2 = arith.constant 2 : index
    %108 = memref.load %arg10[%c2] : memref<4xf32, #tpu.memory_space<smem>>
    %109 = vector.broadcast %108 : f32 to vector<8x8xf32>
    %110 = arith.mulf %109, %41 : vector<8x8xf32>
    %111 = arith.addf %107, %110 : vector<8x8xf32>
    %c2_39 = arith.constant 2 : index
    %112 = memref.load %arg11[%c2_39] : memref<4xf32, #tpu.memory_space<smem>>
    %113 = vector.broadcast %112 : f32 to vector<8x8xf32>
    %114 = arith.mulf %113, %37 : vector<8x8xf32>
    %115 = arith.subf %111, %114 : vector<8x8xf32>
    %cst_40 = arith.constant dense<0.000000e+00> : vector<8x8xf32>
    %116 = tpu.matmul %115, %94, %cst_40 {dimension_numbers = #tpu.dot_dimension_numbers<[1], [0], [0], [1], [0, 0, 1, 1], [], []>} : vector<8x8xf32>, vector<8x8xf32>, vector<8x8xf32> -> vector<8x8xf32>
    %117 = vector.extract_strided_slice %20 {offsets = [0, 24], sizes = [8, 8], strides = [1, 1]} : vector<8x32xf32> to vector<8x8xf32>
    %118 = vector.extract_strided_slice %21 {offsets = [0, 24], sizes = [8, 8], strides = [1, 1]} : vector<8x32xf32> to vector<8x8xf32>
    %119 = vector.extract_strided_slice %14 {offsets = [0, 24], sizes = [8, 8], strides = [1, 1]} : vector<8x32xf32> to vector<8x8xf32>
    %cst_41 = arith.constant dense<0.000000e+00> : vector<8x8xf32>
    %120 = tpu.matmul %117, %118, %cst_41 {dimension_numbers = #tpu.dot_dimension_numbers<[1], [1], [0], [0], [0, 0, 1, 0], [], []>} : vector<8x8xf32>, vector<8x8xf32>, vector<8x8xf32> -> vector<8x8xf32>
    %cst_42 = arith.constant -1.000000e+10 : f32
    %121 = vector.broadcast %cst_42 : f32 to vector<8x8xf32>
    %122 = arith.select %30, %120, %121 : vector<8x8xi1>, vector<8x8xf32>
    %cst_43 = arith.constant dense<0xFF800000> : vector<8xf32>
    %123 = vector.multi_reduction <maximumf>, %122, %cst_43 [1] : vector<8x8xf32> to vector<8xf32>
    %124 = vector.shape_cast %123 : vector<8xf32> to vector<8x1xf32>
    %125 = vector.broadcast %124 : vector<8x1xf32> to vector<8x8xf32>
    %126 = arith.subf %122, %125 : vector<8x8xf32>
    %127 = math.exp %126 : vector<8x8xf32>
    %cst_44 = arith.constant dense<0.000000e+00> : vector<8xf32>
    %128 = vector.multi_reduction <add>, %127, %cst_44 [1] : vector<8x8xf32> to vector<8xf32>
    %129 = vector.shape_cast %128 : vector<8xf32> to vector<8x1xf32>
    %130 = tpu.reciprocal %129 {approx = true} : vector<8x1xf32> -> vector<8x1xf32>
    %131 = vector.broadcast %130 : vector<8x1xf32> to vector<8x8xf32>
    %132 = arith.mulf %127, %131 : vector<8x8xf32>
    %c3 = arith.constant 3 : index
    %133 = memref.load %arg10[%c3] : memref<4xf32, #tpu.memory_space<smem>>
    %134 = vector.broadcast %133 : f32 to vector<8x8xf32>
    %135 = arith.mulf %134, %41 : vector<8x8xf32>
    %136 = arith.addf %132, %135 : vector<8x8xf32>
    %c3_45 = arith.constant 3 : index
    %137 = memref.load %arg11[%c3_45] : memref<4xf32, #tpu.memory_space<smem>>
    %138 = vector.broadcast %137 : f32 to vector<8x8xf32>
    %139 = arith.mulf %138, %37 : vector<8x8xf32>
    %140 = arith.subf %136, %139 : vector<8x8xf32>
    %cst_46 = arith.constant dense<0.000000e+00> : vector<8x8xf32>
    %141 = tpu.matmul %140, %119, %cst_46 {dimension_numbers = #tpu.dot_dimension_numbers<[1], [0], [0], [1], [0, 0, 1, 1], [], []>} : vector<8x8xf32>, vector<8x8xf32>, vector<8x8xf32> -> vector<8x8xf32>
    %142 = tpu.concatenate %66, %91, %116, %141 in 1 : vector<8x8xf32>, vector<8x8xf32>, vector<8x8xf32>, vector<8x8xf32> -> vector<8x32xf32>
    %c0_47 = arith.constant 0 : index
    %143 = memref.load %arg12[%c0_47] : memref<1xf32, #tpu.memory_space<smem>>
    %144 = vector.broadcast %143 : f32 to vector<8x32xf32>
    %145 = arith.mulf %142, %144 : vector<8x32xf32>
    %c0_48 = arith.constant 0 : index
    %c0_49 = arith.constant 0 : index
    %146 = vector.load %arg5[%c0_48, %c0_49] : memref<1x32xf32, #tpu.memory_space<vmem>>, vector<1x32xf32>
    %147 = arith.mulf %1, %1 : vector<8x32xf32>
    %cst_50 = arith.constant dense<0.000000e+00> : vector<8xf32>
    %148 = vector.multi_reduction <add>, %147, %cst_50 [1] : vector<8x32xf32> to vector<8xf32>
    %149 = vector.shape_cast %148 : vector<8xf32> to vector<8x1xf32>
    %cst_51 = arith.constant 3.200000e+01 : f32
    %150 = vector.broadcast %cst_51 : f32 to vector<8x1xf32>
    %151 = arith.divf %149, %150 : vector<8x1xf32>
    %cst_52 = arith.constant 9.99999974E-6 : f32
    %152 = vector.broadcast %cst_52 : f32 to vector<8x1xf32>
    %153 = arith.addf %151, %152 : vector<8x1xf32>
    %154 = math.rsqrt %153 : vector<8x1xf32>
    %155 = vector.broadcast %154 : vector<8x1xf32> to vector<8x32xf32>
    %156 = arith.mulf %1, %155 : vector<8x32xf32>
    %157 = vector.broadcast %146 : vector<1x32xf32> to vector<8x32xf32>
    %158 = arith.mulf %156, %157 : vector<8x32xf32>
    %c0_53 = arith.constant 0 : index
    %c0_54 = arith.constant 0 : index
    %159 = vector.load %arg6[%c0_53, %c0_54] : memref<32x128xf32, #tpu.memory_space<vmem>>, vector<32x128xf32>
    %cst_55 = arith.constant dense<0.000000e+00> : vector<8x128xf32>
    %160 = tpu.matmul %158, %159, %cst_55 {dimension_numbers = #tpu.dot_dimension_numbers<[1], [0], [0], [1], [0, 0, 1, 1], [], []>} : vector<8x32xf32>, vector<32x128xf32>, vector<8x128xf32> -> vector<8x128xf32>
    %c0_56 = arith.constant 0 : index
    %c0_57 = arith.constant 0 : index
    %161 = vector.load %arg7[%c0_56, %c0_57] : memref<1x128xf32, #tpu.memory_space<vmem>>, vector<1x128xf32>
    %162 = vector.broadcast %161 : vector<1x128xf32> to vector<8x128xf32>
    %163 = arith.addf %160, %162 : vector<8x128xf32>
    %cst_58 = arith.constant 0.000000e+00 : f32
    %164 = vector.broadcast %cst_58 : f32 to vector<8x128xf32>
    %165 = arith.maximumf %163, %164 : vector<8x128xf32>
    %c0_59 = arith.constant 0 : index
    %c0_60 = arith.constant 0 : index
    %166 = vector.load %arg8[%c0_59, %c0_60] : memref<128x32xf32, #tpu.memory_space<vmem>>, vector<128x32xf32>
    %cst_61 = arith.constant dense<0.000000e+00> : vector<8x32xf32>
    %167 = tpu.matmul %165, %166, %cst_61 {dimension_numbers = #tpu.dot_dimension_numbers<[1], [0], [0], [1], [0, 0, 1, 1], [], []>} : vector<8x128xf32>, vector<128x32xf32>, vector<8x32xf32> -> vector<8x32xf32>
    %c0_62 = arith.constant 0 : index
    %c0_63 = arith.constant 0 : index
    %168 = vector.load %arg9[%c0_62, %c0_63] : memref<1x32xf32, #tpu.memory_space<vmem>>, vector<1x32xf32>
    %169 = vector.broadcast %168 : vector<1x32xf32> to vector<8x32xf32>
    %170 = arith.addf %167, %169 : vector<8x32xf32>
    %171 = arith.addf %145, %170 : vector<8x32xf32>
    %c0_64 = arith.constant 0 : index
    %c0_65 = arith.constant 0 : index
    %c0_66 = arith.constant 0 : index
    %172 = vector.load %arg13[%c0_64, %c0_65, %c0_66] : memref<1x8x32xf32, #tpu.memory_space<vmem>>, vector<1x8x32xf32>
    %173 = vector.shape_cast %172 : vector<1x8x32xf32> to vector<8x32xf32>
    %174 = vector.shape_cast %171 : vector<8x32xf32> to vector<1x8x32xf32>
    tpu.vector_store %arg13[%c0_64, %c0_65, %c0_66], %174 {strides = array<i32>} : memref<1x8x32xf32, #tpu.memory_space<vmem>>, vector<1x8x32xf32>,
    return
  }
  func.func @transform_0(%arg0: i32) -> (i32, i32, i32) {
    %c0_i32 = arith.constant 0 : i32
    %c0_i32_0 = arith.constant 0 : i32
    %c0_i32_1 = arith.constant 0 : i32
    return %arg0, %c0_i32, %c0_i32_0 : i32, i32, i32
  }
  func.func @transform_1(%arg0: i32) -> (i32, i32) {
    %c0_i32 = arith.constant 0 : i32
    %c0_i32_0 = arith.constant 0 : i32
    %c0_i32_1 = arith.constant 0 : i32
    return %c0_i32, %c0_i32_0 : i32, i32
  }
  func.func @transform_2(%arg0: i32) -> (i32, i32) {
    %c0_i32 = arith.constant 0 : i32
    %c0_i32_0 = arith.constant 0 : i32
    %c0_i32_1 = arith.constant 0 : i32
    return %c0_i32, %c0_i32_0 : i32, i32
  }
  func.func @transform_3(%arg0: i32) -> (i32, i32) {
    %c0_i32 = arith.constant 0 : i32
    %c0_i32_0 = arith.constant 0 : i32
    %c0_i32_1 = arith.constant 0 : i32
    return %c0_i32, %c0_i32_0 : i32, i32
  }
  func.func @transform_4(%arg0: i32) -> (i32, i32) {
    %c0_i32 = arith.constant 0 : i32
    %c0_i32_0 = arith.constant 0 : i32
    %c0_i32_1 = arith.constant 0 : i32
    return %c0_i32, %c0_i32_0 : i32, i32
  }
  func.func @transform_5(%arg0: i32) -> (i32, i32) {
    %c0_i32 = arith.constant 0 : i32
    %c0_i32_0 = arith.constant 0 : i32
    %c0_i32_1 = arith.constant 0 : i32
    return %c0_i32, %c0_i32_0 : i32, i32
  }
  func.func @transform_6(%arg0: i32) -> (i32, i32) {
    %c0_i32 = arith.constant 0 : i32
    %c0_i32_0 = arith.constant 0 : i32
    %c0_i32_1 = arith.constant 0 : i32
    return %c0_i32, %c0_i32_0 : i32, i32
  }
  func.func @transform_7(%arg0: i32) -> (i32, i32) {
    %c0_i32 = arith.constant 0 : i32
    %c0_i32_0 = arith.constant 0 : i32
    %c0_i32_1 = arith.constant 0 : i32
    return %c0_i32, %c0_i32_0 : i32, i32
  }
  func.func @transform_8(%arg0: i32) -> (i32, i32) {
    %c0_i32 = arith.constant 0 : i32
    %c0_i32_0 = arith.constant 0 : i32
    %c0_i32_1 = arith.constant 0 : i32
    return %c0_i32, %c0_i32_0 : i32, i32
  }
  func.func @transform_9(%arg0: i32) -> i32 {
    %c0_i32 = arith.constant 0 : i32
    %c0_i32_0 = arith.constant 0 : i32
    return %c0_i32 : i32
  }
  func.func @transform_10(%arg0: i32) -> i32 {
    %c0_i32 = arith.constant 0 : i32
    %c0_i32_0 = arith.constant 0 : i32
    return %c0_i32 : i32
  }
  func.func @transform_11(%arg0: i32) -> i32 {
    %c0_i32 = arith.constant 0 : i32
    %c0_i32_0 = arith.constant 0 : i32
    return %c0_i32 : i32
  }
  func.func @transform_12(%arg0: i32) -> (i32, i32, i32) {
    %c0_i32 = arith.constant 0 : i32
    %c0_i32_0 = arith.constant 0 : i32
    %c0_i32_1 = arith.constant 0 : i32
    return %arg0, %c0_i32, %c0_i32_0 : i32, i32, i32
  }
  func.func @transform_13(%arg0: i32) -> (i32, i32, i32) {
    %c0_i32 = arith.constant 0 : i32
    %c0_i32_0 = arith.constant 0 : i32
    %c0_i32_1 = arith.constant 0 : i32
    return %arg0, %c0_i32, %c0_i32_0 : i32, i32, i32
  }
  func.func @transform_14(%arg0: i32) -> (i32, i32, i32) {
    %c0_i32 = arith.constant 0 : i32
    %c0_i32_0 = arith.constant 0 : i32
    %c0_i32_1 = arith.constant 0 : i32
    return %arg0, %c0_i32, %c0_i32_0 : i32, i32, i32
  }
}

</mosaic_0001>

<bundles_post_ra>
// kernel: tpu_custom_call.1
= control target key start
LH: loop header
LB: loop body
LE: loop exit
PB: predicated region body
PF: predicated region fallthrough
CT: control target
= control target key end

     0   :  { %s1913_s0 = inlined_call_operand.vmem [shape: f32[2,8,32], index: 0, kind: input, shape index: {}]   ;;  %s1914_s1 = inlined_call_operand.vmem [shape: f32[1,32], index: 1, kind: input, shape index: {}]   ;;  %s1915_s2 = inlined_call_operand.vmem [shape: f32[32,64], index: 2, kind: input, shape index: {}]   ;;  %s1916_s3 = inlined_call_operand.vmem [shape: f32[1,64], index: 3, kind: input, shape index: {}]   ;;  %s1917_s4 = inlined_call_operand.vmem [shape: f32[1,32], index: 4, kind: input, shape index: {}]   ;;  %s1918_s5 = inlined_call_operand.vmem [shape: f32[32,128], index: 5, kind: input, shape index: {}]   ;;  %s1919_s6 = inlined_call_operand.vmem [shape: f32[1,128], index: 6, kind: input, shape index: {}]   ;;  %s1920_s7 = inlined_call_operand.vmem [shape: f32[128,32], index: 7, kind: input, shape index: {}]   ;;  %s1921_s8 = inlined_call_operand.vmem [shape: f32[1,32], index: 8, kind: input, shape index: {}]   ;;  %s1922_s9 = inlined_call_operand.vmem [shape: f32[4], index: 9, kind: input, shape index: {}]   ;;  %s1923_s10 = inlined_call_operand.vmem [shape: f32[4], index: 10, kind: input, shape index: {}]   ;;  %s1924_s11 = inlined_call_operand.<no memory space> [shape: f32[1], index: 11, kind: input, shape index: {}]   ;;  %s1925_s12 = inlined_call_operand.hbm [shape: f32[2,8,32], index: 12, kind: output, shape index: {0}]   ;;  %s1926_s13 = inlined_call_operand.hbm [shape: f32[2,8,32], index: 13, kind: output, shape index: {1}]   ;;  %s1927_s14 = inlined_call_operand.hbm [shape: f32[2,8,32], index: 14, kind: output, shape index: {2}]  }
   0x1   :  { %1935 = sst [smem:[#allocation16_spill]] %s1913_s0 }
   0x2   :  { %1936 = sst [smem:[#allocation17_spill]] %s1914_s1 }
   0x3   :  { %1937 = sst [smem:[#allocation18_spill]] %s1915_s2 }
   0x4   :  { %1938 = sst [smem:[#allocation19_spill]] %s1916_s3 }
   0x5   :  { %1939 = sst [smem:[#allocation20_spill]] %s1917_s4 }
   0x6   :  { %1940 = sst [smem:[#allocation21_spill]] %s1918_s5 }
   0x7   :  { %20 = sst [smem:[#allocation2]] %s1924_s11 }
   0x8   :  { %21 = vsyncpa [#allocation5], 0 }
   0x9   :  { %22 = vsyncpa [#allocation7], 0 }
   0xa   :  { %23 = vsyncpa [#allocation4], 0 }
   0xb   :  { %25 = vsyncpa [#allocation4 + $0x1], 0 }
   0xc   :  { %26 = vsyncpa [#allocation10], 0 }
   0xd   :  { %28 = vsyncpa [#allocation10 + $0x1], 0  ;;  %s1592_s15 = smov 0   ;;  %s1594_s16 = smov 0  }
   0xe   :  { %s1596_s17 = smov 0   ;;  %s1598_s18 = smov 0  }
   0xf LB: > { %s1613_s11 = sadd.s32 4294967295, %s1498_s18   ;;  %s1928_s19 = sadd.s32 4294967294, %s1498_s18   ;;  %s1498_s18 = sphi %s1598_s18, %s1961_s18   ;;  %s1494_s17 = sphi %s1596_s17, %s1960_s17   ;;  %s1490_s16 = sphi %s1594_s16, %s1959_s16   ;;  %s1486_s15 = sphi %s1592_s15, %s1958_s15  }
  0x10   : > { %s1617_s20 = sadd.s32 1, %s1498_s18   ;;  %s298_s21 = sadd.s32 1, %s1494_s17 }
  0x11   : > { %s295_s22 = ssub.s32 %s1498_s18, %s1617_s20  ;;  %p308_p0 = scmp.ne.s32.totalorder %s1494_s17, %s1490_s16 }
  0x12   : > { %p296_p1 = scmp.eq.s32.totalorder %s295_s22, 0  ;;  %p309_p2 = scmp.eq.s32.totalorder %s1613_s11, 1 }
  0x13   : > { %p314_p3 = scmp.ne.s32.totalorder %s1490_s16, %s1486_s15  ;;  %p315_p4 = scmp.eq.s32.totalorder %s1928_s19, 1 }
  0x14   : > { %s1630_s23 = scalar_select %p296_p1, %s1494_s17, %s298_s21  }
  0x15   : > { %p1632_p5 = por %p309_p2, %p308_p0  ;;  %p1636_p6 = por %p315_p4, %p314_p3 }
  0x16   : > { %p1190_p7 = scmp.ge.s32.totalorder %s1498_s18, 1  ;;  %p374_p8 = scmp.lt.s32.totalorder %s1498_s18, 3 }
  0x17   : > { %p1260_p9 = scmp.eq.s32.totalorder %s1613_s11, 0  ;;  %s410_s28 = sshll.u32 %s1922_s9, 4  ;;  %s411_s28 = int_to_ptr.vmem [resolvable:$true] %s410_s28 }
  0x18   : > { %p375_p10 = pnand %p1190_p7, %p374_p8  ;;  %s420_s21 = sshll.u32 %s1923_s10, 4  ;;  %s421_s21 = int_to_ptr.vmem [resolvable:$true] %s420_s21 }
  0x19   : > { %s1500_s22 = smov [#allocation3]   ;;  %s1501_s19 = smov [#allocation6]  }
  0x1a   : > { %p1243_p11 = pneg %p375_p10 }
  0x1b   : > { %443 = sbr.rel (%p375_p10) target bundleno = 1105 (0x451), region = 68 }
  0x1c   : > { %p1244_p12 = pnand %p1260_p9, %p1243_p11 }
  0x1e   : > { %1246 = dma.vmem_to_smem (!%p1244_p12), %s411_s28, 16, %s1500_s22, [#allocation5]  }
  0x1f   : > { %1249 = dma.vmem_to_smem (!%p1244_p12), %s421_s21, 16, %s1501_s19, [#allocation7]  }
  0x20   : > { %1469 = dma.done.wait (%p1260_p9), [#allocation5], 16  }
  0x21   : > { %1471 = vsyncadd (%p1260_p9), [#allocation5], 4294967280 }
  0x22   : > { %1473 = dma.done.wait (%p1260_p9), [#allocation7], 16  }
  0x23   : > { %1475 = vsyncadd (%p1260_p9), [#allocation7], 4294967280 }
  0x24   : > { %455 = sfence }
  0x25   : > { %p505_p13 = scmp.lt.s32.totalorder %s1613_s11, 1  ;;  %s1943_s0 = sld [smem:[#allocation16_spill]]  ;;  %vm512_vm0 = vcmask 261120   ;;  %v1502_v3 = vmov 32.0   ;;  %v964_v30 = vld [vmem:[%s1920_s7 + $0x78] sm:$0xff]  ;;  %v963_v31 = vld [vmem:[%s1920_s7 + $0x70] sm:$0xff]  ;;  %v577_v32 = vlaneseq }
  0x26   : > { %1316 = vrcp.f32 %v1502_v3  ;;  %s1944_s2 = sld [smem:[#allocation18_spill]]  ;;  %s1929_s30 = sand.u32 1, %s1490_s16   ;;  %969 = vmatpush.msra.mxu3 %v964_v30  ;;  %v962_v33 = vld [vmem:[%s1920_s7 + $0x68] sm:$0xff]  ;;  %v961_v36 = vld [vmem:[%s1920_s7 + $0x60] sm:$0xff]  ;;  %v960_v37 = vld [vmem:[%s1920_s7 + $0x58] sm:$0xff]  ;;  %vm602_vm6 = vcmask 64512  }
  0x27   : > { %s506_s26 = scalar_select %p505_p13, %s1613_s11, 1  ;;  %v1710_v34 = vshrl.u32 %v577_v32, 7  ;;  %v1712_v35 = vand.u32 127, %v577_v32  ;;  %v959_v51 = vld [vmem:[%s1920_s7 + $0x50] sm:$0xff]  ;;  %v958_v52 = vld [vmem:[%s1920_s7 + $0x48] sm:$0xff]  ;;  %v957_v53 = vld [vmem:[%s1920_s7 + $0x40] sm:$0xff] }
  0x28   : > { %s1945_s1 = sld [smem:[#allocation17_spill]]  ;;  %s1504_s21 = smov 88   ;;  %970 = vmatpush.msra.mxu3 %v963_v31  ;;  %v956_v54 = vld [vmem:[%s1920_s7 + $0x38] sm:$0xff]  ;;  %v955_v55 = vld [vmem:[%s1920_s7 + $0x30] sm:$0xff]  ;;  %v954_v56 = vld [vmem:[%s1920_s7 + $0x28] sm:$0xff] }
  0x29   : > { %s1200_s27 = sshll.u32 %s506_s26, 3  ;;  %s1683_s26 = sshll.u32 %s1929_s30, 3  ;;  %vm600_vm5 = vcmp.eq.s32.totalorder %v1712_v35, %v1710_v34  ;;  %v953_v57 = vld [vmem:[%s1920_s7 + $0x20] sm:$0xff]  ;;  %v952_v58 = vld [vmem:[%s1920_s7 + $0x18] sm:$0xff]  ;;  %v951_v59 = vld [vmem:[%s1920_s7 + $0x10] sm:$0xff]  ;;  %vm1785_vm7 = vcmp.le.s32.totalorder %v1712_v35, %v1710_v34 }
  0x2a   : > { %s1946_s3 = sld [smem:[#allocation19_spill]]  ;;  %s1505_s22 = smov 96   ;;  %971 = vmatpush.msra.mxu3 %v962_v33  ;;  %v950_v60 = vld [vmem:[%s1920_s7 + $0x8] sm:$0xff]  ;;  %v949_v61 = vld [vmem:[%s1920_s7] sm:$0xff] }
  0x2b   : > { %s508_s29 = scalar_lea.vmem %s1943_s0, %s1200_s27  ;;  %s1930_s27 = scalar_lea.vmem [#allocation11], %s1683_s26 }
  0x2c   : > { %v509_v0 = vld [vmem:[%s508_s29] sm:$0xff]  ;;  %v1317_v4 = vpop.eup %1316  ;;  %v543_v7 = vld [vmem:[%s1944_s2 + $0x18] sm:$0xff]  ;;  %v542_v8 = vld [vmem:[%s1944_s2 + $0x10] sm:$0xff]  ;;  %s1503_s29 = smov 80   ;;  %s1933_s30 = smov 112   ;;  %972 = vmatpush.msra.mxu3 %v961_v36 }
  0x2d   : > { %v511_v1 = vmul.f32 %v509_v0, %v509_v0  ;;  %v517_v5 = vmul.f32 32.0, %v1317_v4  ;;  %563 = vmatpush.msra.mxu0 %v543_v7  ;;  %v541_v10 = vld [vmem:[%s1944_s2 + $0x8] sm:$0xff]  ;;  %v540_v11 = vld [vmem:[%s1944_s2] sm:$0xff]  ;;  %vm521_vm1 = vweird.f32 %v1317_v4  ;;  %s1934_s0 = smov 120   ;;  %s1947_s5 = sld [smem:[#allocation21_spill]] }
  0x2e   : > { %v1311_v23 = vld [vmem:[%s1945_s1] ss:$0 sm:$0xff]  ;;  %s1932_s1 = smov 104   ;;  %973 = vmatpush.msra.mxu3 %v960_v37  ;;  %s1948_s4 = sld [smem:[#allocation20_spill]] }
  0x2f   : > { %v513_v2 = vsel %vm512_vm0, %v511_v1, 0.0  ;;  %v518_v6 = vsub.f32 1.0, %v517_v5  ;;  %564 = vmatpush.msra.mxu0 %v542_v8  ;;  %v1314_v8 = vld [vmem:[%s1919_s6] ss:$0 sm:$0xff]  ;;  %s1951_s2 = smov 120   ;;  %s1952_s28 = smov 112  }
  0x30   : > { %514 = vadd.xlane.f32.xlu0 %v513_v2  ;;  %v1313_v27 = vld [vmem:[%s1946_s3] ss:$0 sm:$0xff]  ;;  %974 = vmatpush.msra.mxu3 %v959_v51  ;;  %s1217_s19 = sld [smem:[#allocation3 + $0x3]] }
  0x31   : > { %v519_v9 = vmul.f32 %v1317_v4, %v518_v6  ;;  %565 = vmatpush.msra.mxu0 %v541_v10 }
  0x32   : > { %975 = vmatpush.msra.mxu3 %v958_v52 }
  0x33   : > { %v520_v12 = vadd.f32 %v1317_v4, %v519_v9  ;;  %566 = vmatpush.msra.mxu0 %v540_v11  ;;  %v920_v41 = vld [vmem:[%s1947_s5 + $0x18] sm:$0xff]  ;;  %v919_v42 = vld [vmem:[%s1947_s5 + $0x10] sm:$0xff]  ;;  %v918_v43 = vld [vmem:[%s1947_s5 + $0x8] sm:$0xff] }
  0x34   : > { %v917_v46 = vld [vmem:[%s1947_s5] sm:$0xff]  ;;  %976 = vmatpush.msra.mxu3 %v957_v53 }
  0x35   : > { %v522_v13 = vsel %vm521_vm1, %v1317_v4, %v520_v12  ;;  %v1312_v47 = vld [vmem:[%s1948_s4] ss:$0 sm:$0xff] }
  0x36   : > { %977 = vmatpush.msra.mxu3 %v956_v54 }
  0x38   : > { %978 = vmatpush.msra.mxu3 %v955_v55 }
  0x3a   : > { %979 = vmatpush.msra.mxu3 %v954_v56 }
  0x3c   : > { %980 = vmatpush.msra.mxu3 %v953_v57 }
  0x3e   : > { %981 = vmatpush.msra.mxu3 %v952_v58 }
  0x40   : > { %982 = vmatpush.msra.mxu3 %v951_v59 }
  0x42   : > { %983 = vmatpush.msra.mxu3 %v950_v60 }
  0x44   : > { %984 = vmatpush.msra.mxu3 %v949_v61 }
  0xa3   : > { %v515_v14 = vpop.xlane.xlu0 %514 }
  0xa4   : > { %v523_v15 = vmul.f32 %v522_v13, %v515_v14 }
  0xa6   : > { %v524_v16 = vadd.f32 1e-05, %v523_v15 }
  0xa8   : > { %1318 = vrsqrt.f32 %v524_v16  ;;  %vm531_vm3 = vweird.f32 %v524_v16 }
  0xae   : > { %v1319_v17 = vpop.eup %1318 }
  0xaf   : > { %v526_v18 = vmul.f32 %v1319_v17, %v524_v16  ;;  %vm532_vm2 = vweird.f32 %v1319_v17 }
  0xb0   : > { %vm533_vm4 = vmor %vm531_vm3, %vm532_vm2 }
  0xb1   : > { %v527_v19 = vmul.f32 %v1319_v17, %v526_v18 }
  0xb3   : > { %v528_v20 = vmul.f32 0.5, %v527_v19 }
  0xb5   : > { %v529_v21 = vsub.f32 1.5, %v528_v20 }
  0xb7   : > { %v530_v22 = vmul.f32 %v1319_v17, %v529_v21 }
  0xb9   : > { %v534_v24 = vsel %vm533_vm4, %v1319_v17, %v530_v22 }
  0xba   : > { %v535_v25 = vmul.f32 %v534_v24, %v509_v0 }
  0xbc   : > { %v1685_v26 = vmul.f32 %v1311_v23, %v535_v25  ;;  %v916_v49 = vmul.f32 %v1312_v47, %v535_v25 }
  0xbe   : > { %1201 = vmatmul.msk.f32.vlgmr.msra.gmra.mxu0 %vm512_vm0, %v1685_v26  ;;  %665 = vmatpush.msra.mxu2 %v1685_v26  ;;  %571 = vst.msk [vmem:[%s1930_s27] sm:$0xff] %vm512_vm0, %v1685_v26  ;;  %s1509_s27 = smov 72  }
 0x13b   : > { %v568_v28 = vpop.f32.mrf.mxu0 }
 0x13c   : > { %v569_v29 = vadd.f32 %v1313_v27, %v568_v28 }
 0x13e   : > { %746 = vrot.lane.b32.xlu2 %v569_v29, %s1503_s29  ;;  %672 = vrot.lane.b32.xlu1 %v569_v29, %s1504_s21  ;;  %s1931_s29 = scalar_lea.vmem [#allocation9], %s1683_s26  ;;  %s1953_s21 = smov 104  }
 0x13f   : > { %573 = vrot.lane.b32.xlu0 %v569_v29, %s1505_s22  ;;  %s1207_s22 = sld [smem:[#allocation3 + $0x1]] }
 0x145   : > { %v711_v58 = vstv %s1207_s22  ;;  %s1388_s22 = scalar_lea.hbm %s1926_s13, 16 }
 0x146   : > { %744 = vrot.lane.b32.xlu2 %v569_v29, %s1933_s30  ;;  %670 = vrot.lane.b32.xlu1 %v569_v29, %s1934_s0  ;;  %s639_s0 = sld [smem:[#allocation3]] }
 0x147   : > { %s643_s30 = sld [smem:[#allocation6]] }
 0x14c   : > { %v640_v52 = vstv %s639_s0  ;;  %s996_s0 = sand.u32 1, %s1613_s11  }
 0x14d   : > { %v644_v55 = vstv %s643_s30  ;;  %s1842_s3 = scalar_lea.sflag [#allocation10], %s996_s0 }
 0x14e   : > { %818 = vrot.lane.b32.xlu2 %v569_v29, %s1932_s1  ;;  %820 = vrot.lane.b32.xlu1 %v569_v29, %s1509_s27  ;;  %s1208_s27 = sld [smem:[#allocation6 + $0x1]] }
 0x14f   : > { %s1212_s1 = sld [smem:[#allocation3 + $0x2]] }
 0x198   : > { %v747_v38 = vpop.permute.xlu2 %746 }
 0x1a0   : > { %v745_v45 = vpop.permute.xlu2 %744 }
 0x1a8   : > { %v819_v50 = vpop.permute.xlu2 %818 }
 0x1b0   : > { %v673_v39 = vpop.permute.xlu1 %672 }
 0x1b1   : > { %v574_v40 = vpop.permute.xlu0 %573  ;;  %1205 = vmatpush.xpose.msk.msrb.mxu0 %vm602_vm6, %v673_v39 }
 0x1b2   : > { %576 = vst.msk [vmem:[%s1931_s29] sm:$0xff] %vm512_vm0, %v574_v40  ;;  %1202 = vmatpush.xpose.msk.msra.mxu1 %vm602_vm6, %v574_v40  ;;  %s1213_s29 = sld [smem:[#allocation6 + $0x2]] }
 0x1b5   : > { %1203 = vmatmul.msk.f32.vlgmr.msra.gmra.mxu1 %vm602_vm6, %v569_v29 }
 0x1b6   : > { %1210 = vmatpush.xpose.msk.msrb.mxu1 %vm602_vm6, %v747_v38  ;;  %v582_v38 = vcvt.s32.f32 %v1710_v34 }
 0x1b8   : > { %v671_v44 = vpop.permute.xlu1 %670  ;;  %v583_v39 = vadd.f32 1.0, %v582_v38 }
 0x1b9   : > { %1206 = vmatmul.msk.f32.vlgmr.msrb.gmra.mxu0 %vm602_vm6, %v671_v44 }
 0x1ba   : > { %940 = vmatpush.msra.mxu1 %v920_v41  ;;  %vm589_vm8 = vweird.f32 %v583_v39  ;;  %v595_v44 = vand.u32 2147483648, %v583_v39 }
 0x1bc   : > { %941 = vmatpush.msra.mxu1 %v919_v42  ;;  %v596_v47 = vor.u32 1.1754944e-38, %v595_v44 }
 0x1bd   : > { %1211 = vmatmul.msk.f32.vlgmr.msrb.gmra.mxu1 %vm602_vm6, %v745_v45 }
 0x1be   : > { %942 = vmatpush.msra.mxu1 %v918_v43 }
 0x1c0   : > { %943 = vmatpush.msra.mxu1 %v917_v46  ;;  %v821_v48 = vpop.permute.xlu1 %820  ;;  %v593_v46 = vand.u32 2147483647, %v583_v39 }
 0x1c1   : > { %1215 = vmatpush.xpose.msk.msra.mxu0 %vm602_vm6, %v821_v48 }
 0x1c2   : > { %vm594_vm11 = vcmp.eq.f32.partialorder %v593_v46, 8.507059e+37 }
 0x1c4   : > { %1216 = vmatmul.msk.f32.vlgmr.msra.gmra.mxu0 %vm602_vm6, %v819_v50  ;;  %v1510_v50 = vmov 0.0  }
 0x1c5   : > { %1220 = vmatmul.msk.f32.vlgmr.msra.gmra.mxu1 %vm512_vm0, %v916_v49  ;;  %v601_v51 = vsel %vm600_vm5, 1.0, %v1510_v50 }
 0x1c6   : > { %v641_v56 = vmul.f32 %v640_v52, %v601_v51  ;;  %v712_v34 = vmul.f32 %v711_v58, %v601_v51 }
 0x232   : > { %v624_v63 = vpop.f32.mrf.mxu1 }
 0x233   : > { %v627_v0 = vsel %vm1785_vm7, %v624_v63, -1e+10  ;;  %v715_v63 = vstv %s1208_s27 }
 0x234   : > { %v628_v1 = vsel %vm602_vm6, %v627_v0, -inf }
 0x235   : > { %629 = vmax.xlane.f32.xlu1 %v628_v1  ;;  %v785_v1 = vstv %s1212_s1  ;;  %s1954_s1 = scalar_lea.vmem [#allocation9], %s1683_s26 }
 0x236   : > { %v695_v2 = vpop.f32.mrf.mxu0 }
 0x237   : > { %v698_v3 = vsel %vm1785_vm7, %v695_v2, -1e+10 }
 0x238   : > { %v699_v4 = vsel %vm602_vm6, %v698_v3, -inf }
 0x239   : > { %700 = vmax.xlane.f32.xlu2 %v699_v4  ;;  %v789_v4 = vstv %s1213_s29  ;;  %s1028_s29 = sshll.u32 %s1954_s1, 4  ;;  %s1029_s29 = int_to_ptr.vmem [resolvable:$true] %s1028_s29 }
 0x23a   : > { %v769_v5 = vpop.f32.mrf.mxu1 }
 0x23b   : > { %v772_v6 = vsel %vm1785_vm7, %v769_v5, -1e+10  ;;  %v786_v5 = vmul.f32 %v785_v1, %v601_v51 }
 0x23c   : > { %v773_v7 = vsel %vm602_vm6, %v772_v6, -inf }
 0x23d   : > { %774 = vmax.xlane.f32.xlu0 %v773_v7 }
 0x241   : > { %v843_v9 = vpop.f32.mrf.mxu0 }
 0x242   : > { %v846_v10 = vsel %vm1785_vm7, %v843_v9, -1e+10  ;;  %v945_v11 = vpop.f32.mrf.mxu1 }
 0x243   : > { %v946_v12 = vadd.f32 %v1314_v8, %v945_v11  ;;  %v847_v13 = vsel %vm602_vm6, %v846_v10, -inf }
 0x244   : > { %848 = vmax.xlane.f32.xlu2 %v847_v13  ;;  %v859_v13 = vstv %s1217_s19  ;;  %s1512_s19 = smov 16  }
 0x245   : > { %v948_v14 = vmax.f32 %v946_v12, 0.0 }
 0x247   : > { %985 = vmatmul.f32.vlgmr.msra.gmra.mxu3 %v948_v14 }
 0x2a8   : > { %v630_v15 = vpop.xlane.xlu1 %629 }
 0x2a9   : > { %v631_v16 = vsub.f32 %v627_v0, %v630_v15 }
 0x2ab   : > { %v632_v17 = vmul.f32 1.442695, %v631_v16  ;;  %v860_v16 = vmul.f32 %v859_v13, %v601_v51 }
 0x2ac   : > { %v701_v18 = vpop.xlane.xlu2 %700 }
 0x2ad   : > { %1320 = vpow2.f32 %v632_v17  ;;  %v702_v19 = vsub.f32 %v698_v3, %v701_v18 }
 0x2af   : > { %v703_v20 = vmul.f32 1.442695, %v702_v19 }
 0x2b0   : > { %v775_v21 = vpop.xlane.xlu0 %774 }
 0x2b1   : > { %1322 = vpow2.f32 %v703_v20  ;;  %v776_v22 = vsub.f32 %v772_v6, %v775_v21 }
 0x2b3   : > { %v1321_v23 = vpop.eup %1320  ;;  %v777_v24 = vmul.f32 1.442695, %v776_v22 }
 0x2b4   : > { %v634_v25 = vsel %vm602_vm6, %v1321_v23, 0.0 }
 0x2b5   : > { %1324 = vpow2.f32 %v777_v24  ;;  %635 = vadd.xlane.f32.xlu1 %v634_v25 }
 0x2b7   : > { %v1323_v27 = vpop.eup %1322  ;;  %v849_v28 = vpop.xlane.xlu2 %848 }
 0x2b8   : > { %v850_v29 = vsub.f32 %v846_v10, %v849_v28  ;;  %v705_v30 = vsel %vm602_vm6, %v1323_v27, 0.0 }
 0x2b9   : > { %706 = vadd.xlane.f32.xlu0 %v705_v30 }
 0x2ba   : > { %v851_v31 = vmul.f32 1.442695, %v850_v29 }
 0x2bb   : > { %v1806_v32 = vpop.eup %1324 }
 0x2bc   : > { %1326 = vpow2.f32 %v851_v31  ;;  %v779_v33 = vsel %vm602_vm6, %v1806_v32, 0.0 }
 0x2bd   : > { %780 = vadd.xlane.f32.xlu2 %v779_v33  ;;  %1328 = vrcp.f32 %v583_v39 }
 0x2c2   : > { %v1810_v36 = vpop.eup %1326 }
 0x2c3   : > { %v853_v37 = vsel %vm602_vm6, %v1810_v36, 0.0  ;;  %v1329_v40 = vpop.eup %1328 }
 0x2c4   : > { %854 = vadd.xlane.f32.xlu0 %v853_v37  ;;  %v585_v41 = vmul.f32 %v1329_v40, %v583_v39  ;;  %vm590_vm9 = vweird.f32 %v1329_v40 }
 0x2c5   : > { %vm591_vm10 = vmor %vm589_vm8, %vm590_vm9 }
 0x2c6   : > { %v586_v42 = vsub.f32 1.0, %v585_v41 }
 0x2c8   : > { %v587_v43 = vmul.f32 %v1329_v40, %v586_v42 }
 0x2ca   : > { %v588_v45 = vadd.f32 %v1329_v40, %v587_v43 }
 0x2cc   : > { %v592_v48 = vsel %vm591_vm10, %v1329_v40, %v588_v45 }
 0x2cd   : > { %v597_v49 = vsel %vm594_vm11, %v596_v47, %v592_v48 }
 0x2ce   : > { %718 = vrot.lane.b32.xlu1 %v1685_v26, %s1951_s2  ;;  %v599_v54 = vsel %vm1785_vm7, %v597_v49, 0.0  ;;  %s1218_s2 = sld [smem:[#allocation6 + $0x3]] }
 0x2cf   : > { %v645_v61 = vmul.f32 %v644_v55, %v599_v54  ;;  %v716_v62 = vmul.f32 %v715_v63, %v599_v54  ;;  %v790_v11 = vmul.f32 %v789_v4, %v599_v54 }
 0x2d4   : > { %v863_v14 = vstv %s1218_s2 }
 0x2d5   : > { %792 = vrot.lane.b32.xlu2 %v1685_v26, %s1952_s28  ;;  %v864_v18 = vmul.f32 %v863_v14, %v599_v54  ;;  %s1511_s28 = smov 8  }
 0x2d8   : > { %866 = vrot.lane.b32.xlu0 %v1685_v26, %s1953_s21  ;;  %s1833_s21 = sshll.u32 %s1613_s11, 3 }
 0x2d9   : > { %s1026_s27 = scalar_lea.hbm %s1926_s13, %s1833_s21 }
 0x2da   : > { %s1030_s2 = sshll.u32 %s1026_s27, 4  ;;  %s1031_s2 = int_to_ptr.hbm [resolvable:$true] %s1030_s2 }
 0x328   : > { %v636_v26 = vpop.xlane.xlu1 %635 }
 0x329   : > { %1330 = vrcp.f32 %v636_v26 }
 0x32c   : > { %v707_v53 = vpop.xlane.xlu0 %706 }
 0x32d   : > { %1332 = vrcp.f32 %v707_v53 }
 0x32f   : > { %v1331_v57 = vpop.eup %1330 }
 0x330   : > { %v638_v59 = vmul.f32 %v1331_v57, %v1321_v23  ;;  %v781_v60 = vpop.xlane.xlu2 %780 }
 0x331   : > { %1334 = vrcp.f32 %v781_v60 }
 0x332   : > { %v642_v0 = vadd.f32 %v641_v56, %v638_v59 }
 0x333   : > { %v1333_v35 = vpop.eup %1332 }
 0x334   : > { %v709_v2 = vmul.f32 %v1333_v35, %v1323_v27  ;;  %v646_v3 = vsub.f32 %v642_v0, %v645_v61 }
 0x336   : > { %1204 = vmatmul.msk.f32.vlgmr.msra.gmra.mxu2 %vm602_vm6, %v646_v3  ;;  %v713_v6 = vadd.f32 %v712_v34, %v709_v2 }
 0x337   : > { %v1335_v7 = vpop.eup %1334  ;;  %v855_v8 = vpop.xlane.xlu0 %854 }
 0x338   : > { %v783_v9 = vmul.f32 %v1335_v7, %v1806_v32  ;;  %1336 = vrcp.f32 %v855_v8  ;;  %v717_v10 = vsub.f32 %v713_v6, %v716_v62  ;;  %v793_v22 = vpop.permute.xlu2 %792 }
 0x33a   : > { %v787_v12 = vadd.f32 %v786_v5, %v783_v9 }
 0x33c   : > { %v791_v15 = vsub.f32 %v787_v12, %v790_v11 }
 0x33e   : > { %v1337_v17 = vpop.eup %1336 }
 0x33f   : > { %v857_v19 = vmul.f32 %v1337_v17, %v1810_v36 }
 0x340   : > { %v719_v20 = vpop.permute.xlu1 %718 }
 0x341   : > { %v861_v21 = vadd.f32 %v860_v16, %v857_v19  ;;  %739 = vmatpush.msrb.mxu2 %v719_v20 }
 0x342   : > { %1209 = vmatmul.msk.f32.vlgmr.msrb.gmra.mxu2 %vm602_vm6, %v717_v10 }
 0x343   : > { %v865_v23 = vsub.f32 %v861_v21, %v864_v18  ;;  %813 = vmatpush.msra.mxu2 %v793_v22 }
 0x34a   : > { %1214 = vmatmul.msk.f32.vlgmr.msra.gmra.mxu2 %vm602_vm6, %v791_v15  ;;  %v867_v24 = vpop.permute.xlu0 %866 }
 0x34b   : > { %887 = vmatpush.msrb.mxu2 %v867_v24 }
 0x352   : > { %1219 = vmatmul.msk.f32.vlgmr.msrb.gmra.mxu2 %vm602_vm6, %v865_v23 }
 0x3b9   : > { %v667_v25 = vpop.f32.mrf.mxu2 }
 0x3c5   : > { %v741_v27 = vpop.f32.mrf.mxu2 }
 0x3c6   : > { %893 = vrot.lane.b32.xlu1 %v741_v27, %s1511_s28  ;;  %s1382_s28 = sshra.s32 %s1031_s2, 4  ;;  %s1383_s28 = int_to_ptr.hbm [resolvable:$true] %s1382_s28 }
 0x3c7   : > { %s1384_s4 = scalar_lea.hbm %s1383_s28, 8  ;;  %p1389_p3 = scmp.lt.s32.totalorder %s1383_s28, %s1926_s13 }
 0x3c8   : > { %p1385_p0 = scmp.ne.s32.totalorder %s1383_s28, %s1384_s4  ;;  %p1390_p4 = scmp.lt.s32.totalorder %s1388_s22, %s1384_s4 }
 0x3ca   : > { %p1386_p1 = pnand %p1385_p0, %p1632_p5  ;;  %p1391_p7 = por %p1390_p4, %p1389_p3 }
 0x3cc   : > { %p1387_p2 = pneg %p1386_p1 }
 0x3cd   : > { %v815_v28 = vpop.f32.mrf.mxu2 }
 0x3ce   : > { %897 = vrot.lane.b32.xlu2 %v815_v28, %s1512_s19  ;;  %p1392_p8 = pnand %p1391_p7, %p1387_p2 }
 0x3d0   : > { %1395 = shalt.err (!%p1392_p8)
}
 0x3d1   : > { %1238 = dma.vmem_to_hbm [thread:$0]  (%p1632_p5), %s1029_s29, 128, %s1031_s2, %s1842_s3  }
 0x3d2   : > { %s1040_s19 = scalar_lea.hbm %s1927_s14, %s1833_s21  ;;  %s1955_s11 = scalar_lea.vmem [#allocation11], %s1683_s26 }
 0x3d3   : > { %s1042_s30 = sshll.u32 %s1955_s11, 4  ;;  %s1044_s5 = sshll.u32 %s1040_s19, 4  ;;  %s1043_s30 = int_to_ptr.vmem [resolvable:$true] %s1042_s30  ;;  %s1045_s5 = int_to_ptr.hbm [resolvable:$true] %s1044_s5 }
 0x3d4   : > { %s1513_s4 = smov 24   ;;  %s1410_s28 = sshra.s32 %s1045_s5, 4  ;;  %s1411_s28 = int_to_ptr.hbm [resolvable:$true] %s1410_s28 }
 0x3d5   : > { %v889_v29 = vpop.f32.mrf.mxu2  ;;  %s1412_s22 = scalar_lea.hbm %s1411_s28, 8  ;;  %s1416_s1 = scalar_lea.hbm %s1927_s14, 16 }
 0x3d6   : > { %901 = vrot.lane.b32.xlu0 %v889_v29, %s1513_s4  ;;  %p1413_p9 = scmp.ne.s32.totalorder %s1411_s28, %s1412_s22  ;;  %p1417_p12 = scmp.lt.s32.totalorder %s1411_s28, %s1927_s14 }
 0x3d7   : > { %p1418_p13 = scmp.lt.s32.totalorder %s1416_s1, %s1412_s22 }
 0x3d8   : > { %p1414_p10 = pnand %p1413_p9, %p1632_p5 }
 0x3d9   : > { %p1419_p0 = por %p1418_p13, %p1417_p12 }
 0x3da   : > { %p1415_p11 = pneg %p1414_p10 }
 0x3dc   : > { %p1420_p1 = pnand %p1419_p0, %p1415_p11 }
 0x3de   : > { %1423 = shalt.err (!%p1420_p1)
}
 0x3df   : > { %1239 = dma.vmem_to_hbm [thread:$0]  (%p1632_p5), %s1043_s30, 128, %s1045_s5, %s1842_s3   ;;  %vm905_vm12 = vcmask 130048   ;;  %v1315_v32 = vld [vmem:[%s1921_s8] ss:$0 sm:$0xff]  ;;  %vm907_vm13 = vcmask 195584   ;;  %v986_v33 = vpop.f32.mrf.mxu3 }
 0x3e0   : > { %s909_s19 = sld [smem:[#allocation2]]  ;;  %s1012_s29 = scalar_lea.hbm %s1925_s12, %s1833_s21  ;;  %v987_v41 = vadd.f32 %v1315_v32, %v986_v33 }
 0x3e1   : > { %s490_s3 = scalar_lea.vmem [#allocation8], %s1683_s26  ;;  %s1016_s5 = sshll.u32 %s1012_s29, 4  ;;  %s1017_s5 = int_to_ptr.hbm [resolvable:$true] %s1016_s5 }
 0x3e2   : > { %s1014_s30 = sshll.u32 %s490_s3, 4  ;;  %s1956_s2 = sand.u32 1, %s1490_s16   ;;  %s1015_s30 = int_to_ptr.vmem [resolvable:$true] %s1014_s30 }
 0x3e3   : > { %s992_s21 = scalar_lea.sflag [#allocation4], %s1956_s2  ;;  %s1438_s1 = sshra.s32 %s1017_s5, 4  ;;  %s1439_s1 = int_to_ptr.hbm [resolvable:$true] %s1438_s1 }
 0x3e4   : > { %s1440_s0 = scalar_lea.hbm %s1439_s1, 8  ;;  %p1445_p7 = scmp.lt.s32.totalorder %s1439_s1, %s1925_s12 }
 0x3e5   : > { %p1441_p2 = scmp.ne.s32.totalorder %s1439_s1, %s1440_s0 }
 0x3e6   : > { %v910_v37 = vstv %s909_s19  ;;  %s1444_s19 = scalar_lea.hbm %s1925_s12, 16 }
 0x3e7   : > { %p1442_p3 = pnand %p1441_p2, %p1632_p5  ;;  %p1446_p8 = scmp.lt.s32.totalorder %s1444_s19, %s1440_s0 }
 0x3e9   : > { %p1443_p4 = pneg %p1442_p3  ;;  %p1447_p9 = por %p1446_p8, %p1445_p7 }
 0x3eb   : > { %p1448_p10 = pnand %p1447_p9, %p1443_p4 }
 0x428   : > { %v898_v36 = vpop.permute.xlu2 %897 }
 0x438   : > { %v894_v30 = vpop.permute.xlu1 %893 }
 0x439   : > { %v904_v31 = vsel %vm602_vm6, %v667_v25, %v894_v30 }
 0x43a   : > { %v906_v38 = vsel %vm905_vm12, %v904_v31, %v898_v36 }
 0x448   : > { %v902_v39 = vpop.permute.xlu0 %901 }
 0x449   : > { %v908_v40 = vsel %vm907_vm13, %v906_v38, %v902_v39 }
 0x44a   : > { %v911_v42 = vmul.f32 %v910_v37, %v908_v40 }
 0x44c   : > { %v989_v43 = vadd.f32 %v987_v41, %v911_v42 }
 0x44e   : > { %990 = vst.msk [vmem:[%s490_s3] sm:$0xff] %vm512_vm0, %v989_v43 }
 0x44f   : > { %1451 = shalt.err (!%p1448_p10)
}
 0x450   : > { %1237 = dma.vmem_to_hbm [thread:$0]  (%p1632_p5), %s1015_s30, 128, %s1017_s5, %s992_s21  }
 0x451 PF: > { %p1264_p11 = scmp.ge.s32.totalorder %s1498_s18, 2  ;;  %s1056_s28 = sand.u32 1, %s1486_s15  }
 0x452   : > { %s1057_s22 = scalar_lea.sflag [#allocation4], %s1056_s28 }
 0x453   : > { %p1251_p12 = pnand %p1264_p11, %p1636_p6 }
 0x455   : > { %p1252_p13 = pneg %p1251_p12 }
 0x457   : > { %1477 = dma.done.wait (%p1252_p13), %s1057_s22, 128  }
 0x458   : > { %1479 = vsyncadd (%p1252_p13), %s1057_s22, 4294967168  ;;  %s1957_s29 = sadd.s32 4294967294, %s1498_s18  }
 0x459   : > { %s1066_s3 = sand.u32 1, %s1957_s29  }
 0x45a   : > { %s1067_s2 = scalar_lea.sflag [#allocation10], %s1066_s3 }
 0x45b   : > { %1481 = dma.done.wait (%p1252_p13), %s1067_s2, 256  }
 0x45c   : > { %1483 = vsyncadd (%p1252_p13), %s1067_s2, 4294967040  ;;  %p31_p5 = scmp.ge.s32.totalorder %s1617_s20, 4   ;;  %s1958_s15 = smov %s1490_s16 }
 0x45d   : > { %s1959_s16 = smov %s1494_s17  ;;  %s1960_s17 = smov %s1630_s23 }
 0x45e   : > { %s1961_s18 = smov %s1617_s20  ;;  %33 = sbr.rel (!%p31_p5) target bundleno = 15 (0xf), region = 144 }
 0x463   :  { %1083 = vsyncpa [#allocation4], 1 }
 0x464   :  { %1085 = vsyncpa [#allocation4 + $0x1], 1 }
 0x465   :  { %1086 = vsyncpa [#allocation10], 1 }
 0x466   :  { %1088 = vsyncpa [#allocation10 + $0x1], 1 }
 0x467   :  { %1089 = vsyncpa [#allocation5], 1 }
 0x468   :  { %1091 = vsyncpa [#allocation5 + $0x1], 1 }
 0x469   :  { %1092 = vsyncpa [#allocation7], 1 }

</bundles_post_ra>
